<compile_context>
chip_gen: v7x
topology: tpu7x:2x2x1
jax: 0.10.0
libtpu: 0.0.40
codegen_flags: <defaults>
</compile_context>

<pallas_src>
import functools

import jax
import jax.numpy as jnp
from jax.experimental import pallas as pl
from jax.experimental.pallas import tpu as pltpu


# ----------------------------------------------------------------------------
# Kernel 1: pairwise squared distance  dist = -2*src.dst + |src|^2 + |dst|^2
#   src: (B, S, 3) channel-last queries;  dstT: (B, 3, N) channel-first points.
#   One grid-less call: B*S*N is tiny, and the cross term runs on the MXU.
# ----------------------------------------------------------------------------
def _sqdist_kernel(src_ref, dstT_ref, out_ref):
    src = src_ref[...]                                    # (B, S, 3)
    dstT = dstT_ref[...]                                  # (B, 3, N)
    cross = jnp.einsum(
        "bsc,bcn->bsn", src, dstT, preferred_element_type=jnp.float32
    )                                                     # (B, S, N)  MXU
    s2 = jnp.sum(src * src, axis=-1)[:, :, None]          # (B, S, 1)
    d2 = jnp.sum(dstT * dstT, axis=1)[:, None, :]         # (B, 1, N)
    out_ref[...] = -2.0 * cross + s2 + d2


def pallas_square_distance(src, dst_t):
    # src: (B, S, 3), dst_t: (B, 3, N) -> (B, S, N)
    B, S, _ = src.shape
    N = dst_t.shape[-1]
    return pl.pallas_call(
        _sqdist_kernel,
        out_shape=jax.ShapeDtypeStruct((B, S, N), jnp.float32),
    )(src, dst_t)


# ----------------------------------------------------------------------------
# Kernel 2: per-group MLP (1x1 conv == matmul over channels, BN folded into the
# weights) + shift + ReLU + max over nsample, G groups per grid step.
# ----------------------------------------------------------------------------
def _mlp_max_kernel(x_ref, w1_ref, t1_ref, w2_ref, t2_ref, out_ref, *, nsample):
    # x_ref: (G*K, Cin) in compute dtype, weights in compute dtype, shifts f32.
    x = x_ref[...]
    h = jnp.dot(x, w1_ref[...], preferred_element_type=jnp.float32)   # (G*K, C1) MXU
    h = jnp.maximum(h + t1_ref[...], 0.0)                              # folded BN + ReLU
    h = jnp.dot(h.astype(w2_ref.dtype), w2_ref[...],
                preferred_element_type=jnp.float32)                    # (G*K, C2) MXU
    h = jnp.maximum(h + t2_ref[...], 0.0)
    gk, c2 = h.shape
    # K == 8 keeps this reshape exactly sublane-tile aligned for f32.
    h = h.reshape(gk // nsample, nsample, c2)                          # (G, K, C2)
    out_ref[...] = jnp.max(h, axis=1)                                  # (G, C2) lane-dense


def pallas_mlp_max(x, w1, t1, w2, t2, *, group_block=256,
                   compute_dtype=jnp.bfloat16):
    """x: (BS, K, Cin) f32 grouped points -> (BS, C2) f32 pooled features."""
    BS, K, Cin = x.shape
    C1 = w1.shape[1]
    C2 = w2.shape[1]

    # Batch up to `group_block` groups per grid step (amortizes per-step overhead,
    # feeds the MXU >=128 rows).  256 is safe for v5e's 16 MiB scoped VMEM; can be
    # raised to 512-1024 on v6e/v7x.
    G = max(1, min(group_block, BS))
    BSp = ((BS + G - 1) // G) * G
    if BSp != BS:
        x = jnp.pad(x, ((0, BSp - BS), (0, 0), (0, 0)))

    # Pre-flatten rows in XLA so the kernel works on clean 2-D slabs.
    x2 = x.reshape(BSp * K, Cin).astype(compute_dtype)
    w1c = w1.astype(compute_dtype)
    w2c = w2.astype(compute_dtype)
    t1f = t1.astype(jnp.float32)
    t2f = t2.astype(jnp.float32)

    out = pl.pallas_call(
        functools.partial(_mlp_max_kernel, nsample=K),
        out_shape=jax.ShapeDtypeStruct((BSp, C2), jnp.float32),
        grid=(BSp // G,),
        in_specs=[
            pl.BlockSpec((G * K, Cin), lambda g: (g, 0)),
            # Constant-index blocks: DMA'd once, VMEM resident for the whole grid.
            pl.BlockSpec((Cin, C1), lambda g: (0, 0)),
            pl.BlockSpec((1, C1), lambda g: (0, 0)),
            pl.BlockSpec((C1, C2), lambda g: (0, 0)),
            pl.BlockSpec((1, C2), lambda g: (0, 0)),
        ],
        out_specs=pl.BlockSpec((G, C2), lambda g: (g, 0)),
        compiler_params=pltpu.CompilerParams(
            dimension_semantics=("parallel",)),
    )(x2, w1c, t1f, w2c, t2f)
    return out[:BS]


# ----------------------------------------------------------------------------
# Plain-JAX glue: ball query (top-k of indices) and gather.
# TODO(synk): fuse the gather + concat into the MLP kernel via
# PrefetchScalarGridSpec (idx in SMEM, xyz/points in pl.ANY + manual DMA) to kill
# the grouped-tensor HBM round trip at realistic N/S; at these toy sizes the XLA
# gather is cheaper and simpler.
# ----------------------------------------------------------------------------
def index_points(points, idx):
    # points: (B, N, C), idx: (B, ...) int -> (B, ..., C)
    return jax.vmap(lambda p, i: p[i])(points, idx)


def query_ball_point(radius, nsample, N, sqrdists):
    """Matches the PyTorch sort-based ball query, but uses top_k of the negated
    indices (O(N*nsample-ish)) instead of a full O(N log N) sort."""
    B, S, _ = sqrdists.shape
    idx = jnp.broadcast_to(jnp.arange(N, dtype=jnp.int32)[None, None, :], (B, S, N))
    idx = jnp.where(sqrdists > radius ** 2, N, idx)           # sentinel N when outside
    neg_topk, _ = jax.lax.top_k(-idx, nsample)                # nsample smallest indices
    group_idx = -neg_topk                                     # ascending, like sort[:, :nsample]
    group_first = jnp.broadcast_to(group_idx[:, :, :1], (B, S, nsample))
    # If a slot is still the sentinel, replace with the first in-ball index.  (If the
    # ball is empty, group_first is also N and the later gather clamps to N-1 — same
    # quirk as the PyTorch reference.)
    group_idx = jnp.where(group_idx == N, group_first, group_idx)
    return group_idx


# ----------------------------------------------------------------------------
# Forward pass matching PointNetSetAbstraction.forward
# ----------------------------------------------------------------------------
def pointnet_set_abstraction_forward(xyz, points, query_pts, params, *, radius,
                                     nsample, group_block=256,
                                     compute_dtype=jnp.bfloat16):
    """
    xyz:       (B, 3, N)  channel-first, as in the PyTorch module
    points:    (B, D, N)
    query_pts: (B, 3)     one query point per batch element (reshape(-1, 1, 3))
    returns:   new_xyz (B, 1, 3), new_points (B, C_out, S)
    """
    B, _, N = xyz.shape
    xyz_t = jnp.transpose(xyz, (0, 2, 1))        # (B, N, 3) for the gather
    pts_t = jnp.transpose(points, (0, 2, 1))     # (B, N, D)
    new_xyz = query_pts.reshape(-1, 1, 3)        # (B, 1, 3)
    S = new_xyz.shape[1]

    # --- sample_and_group ---
    # xyz is already (B, 3, N): exactly the transposed operand the MXU dot wants.
    sqrdists = pallas_square_distance(new_xyz, xyz)                  # (B, S, N)  Pallas
    idx = query_ball_point(radius, nsample, N, sqrdists)             # (B, S, K)
    grouped_xyz = index_points(xyz_t, idx)                           # (B, S, K, 3)
    grouped_ft = index_points(pts_t, idx)                            # (B, S, K, D)
    grouped = jnp.concatenate([grouped_xyz, grouped_ft], axis=-1)    # (B, S, K, 3+D)

    # --- shared MLP (1x1 conv + folded BN + ReLU) + max over nsample, in Pallas ---
    Cin = grouped.shape[-1]
    x = grouped.reshape(B * S, nsample, Cin)                         # channel-last
    out = pallas_mlp_max(x, params["w1"], params["t1"],
                         params["w2"], params["t2"],
                         group_block=group_block,
                         compute_dtype=compute_dtype)                # (B*S, C2)
    C2 = out.shape[-1]
    new_points = out.reshape(B, S, C2)
    # Single cheap transpose at the very end to match torch's (B, C_out, S).
    new_points = jnp.transpose(new_points, (0, 2, 1))
    return new_xyz, new_points


def make_params(key, c_in, mlp_channels=(16, 32), eps=1e-5):
    """Deterministic synthetic Conv2d(1x1)+BatchNorm2d params.  The BN scale is folded
    into the conv weights (column scaling) offline; only the shift survives into the
    kernel, i.e. layer(x) = relu(x @ w_folded + t)."""
    ks = jax.random.split(key, 4 * len(mlp_channels))
    params = {}
    c_prev = c_in
    for li, c_out in enumerate(mlp_channels, start=1):
        w = 0.1 * jax.random.normal(ks[4 * li - 4], (c_prev, c_out), jnp.float32)
        b = 0.1 * jax.random.normal(ks[4 * li - 3], (c_out,), jnp.float32)
        gamma = 1.0 + 0.05 * jax.random.normal(ks[4 * li - 2], (c_out,), jnp.float32)
        beta = 0.05 * jax.random.normal(ks[4 * li - 1], (c_out,), jnp.float32)
        running_mean = jnp.zeros((c_out,), jnp.float32)
        running_var = jnp.ones((c_out,), jnp.float32)
        scale = gamma / jnp.sqrt(running_var + eps)                  # BN scale
        shift = beta + scale * (b - running_mean)                    # BN shift (incl. bias)
        params[f"w{li}"] = w * scale[None, :]                        # fold scale into W
        params[f"t{li}"] = shift.reshape(1, c_out)
        c_prev = c_out
    return params


if __name__ == "__main__":
    B, N, D = 2, 64, 4          # batch, num points, feature channels
    nsample = 8                 # keeps the in-kernel reshape sublane-tile aligned
    radius = 0.8
    c_in = 3 + D

    key = jax.random.PRNGKey(0)
    k_xyz, k_pts, k_q, k_par = jax.random.split(key, 4)
    xyz = jax.random.uniform(k_xyz, (B, 3, N), jnp.float32)        # (B, 3, N)
    points = jax.random.normal(k_pts, (B, D, N), jnp.float32)      # (B, D, N)
    query_pts = jax.random.uniform(k_q, (B, 3), jnp.float32)       # (B, 3)

    params = make_params(k_par, c_in, mlp_channels=(16, 32))

    fwd = jax.jit(functools.partial(pointnet_set_abstraction_forward,
                                    radius=radius, nsample=nsample))
    new_xyz, new_points = fwd(xyz, points, query_pts, params)
    jax.block_until_ready((new_xyz, new_points))

    assert new_xyz.shape == (B, 1, 3)
    assert new_points.shape == (B, 32, 1)
    print("KERNEL_OK")
</pallas_src>

<mosaic_0001>
module attributes {stable_mosaic.version = 11 : i64} {
  func.func @_sqdist_kernel(%arg0: memref<2x1x3xf32, #tpu.memory_space<vmem>>, %arg1: memref<2x3x64xf32, #tpu.memory_space<vmem>>, %arg2: memref<2x1x64xf32, #tpu.memory_space<vmem>>) attributes {dimension_semantics = [], scalar_prefetch = 0 : i64, scratch_operands = 0 : i64, tpu.core_type = #tpu.core_type<tc>} {
    %c0 = arith.constant 0 : index
    %c0_0 = arith.constant 0 : index
    %c0_1 = arith.constant 0 : index
    %0 = vector.load %arg0[%c0, %c0_0, %c0_1] : memref<2x1x3xf32, #tpu.memory_space<vmem>>, vector<2x1x3xf32>
    %c0_2 = arith.constant 0 : index
    %c0_3 = arith.constant 0 : index
    %c0_4 = arith.constant 0 : index
    %1 = vector.load %arg1[%c0_2, %c0_3, %c0_4] : memref<2x3x64xf32, #tpu.memory_space<vmem>>, vector<2x3x64xf32>
    "tpu.trace_start"() <{level = 10 : i32, message = "bsc,bcn->bsn"}> : () -> ()
    %cst = arith.constant dense<0.000000e+00> : vector<2x1x64xf32>
    %2 = tpu.matmul %0, %1, %cst {dimension_numbers = #tpu.dot_dimension_numbers<[2], [1], [1], [2], [0, 0, 0, 1, 1, 2], [0], [0]>} : vector<2x1x3xf32>, vector<2x3x64xf32>, vector<2x1x64xf32> -> vector<2x1x64xf32>
    "tpu.trace_stop"() : () -> ()
    %3 = arith.mulf %0, %0 : vector<2x1x3xf32>
    %cst_5 = arith.constant dense<0.000000e+00> : vector<2x1xf32>
    %4 = vector.multi_reduction <add>, %3, %cst_5 [2] : vector<2x1x3xf32> to vector<2x1xf32>
    %5 = vector.shape_cast %4 : vector<2x1xf32> to vector<2x1x1xf32>
    %6 = arith.mulf %1, %1 : vector<2x3x64xf32>
    %cst_6 = arith.constant dense<0.000000e+00> : vector<2x64xf32>
    %7 = vector.multi_reduction <add>, %6, %cst_6 [1] : vector<2x3x64xf32> to vector<2x64xf32>
    %8 = vector.shape_cast %7 : vector<2x64xf32> to vector<2x1x64xf32>
    %cst_7 = arith.constant -2.000000e+00 : f32
    %9 = vector.broadcast %cst_7 : f32 to vector<2x1x64xf32>
    %10 = arith.mulf %9, %2 : vector<2x1x64xf32>
    %11 = vector.broadcast %5 : vector<2x1x1xf32> to vector<2x1x64xf32>
    %12 = arith.addf %10, %11 : vector<2x1x64xf32>
    %13 = arith.addf %12, %8 : vector<2x1x64xf32>
    %c0_8 = arith.constant 0 : index
    %c0_9 = arith.constant 0 : index
    %c0_10 = arith.constant 0 : index
    %14 = vector.load %arg2[%c0_8, %c0_9, %c0_10] : memref<2x1x64xf32, #tpu.memory_space<vmem>>, vector<2x1x64xf32>
    tpu.vector_store %arg2[%c0_8, %c0_9, %c0_10], %13 {strides = array<i32>} : memref<2x1x64xf32, #tpu.memory_space<vmem>>, vector<2x1x64xf32>,
    return
  }
}

module attributes {stable_mosaic.version = 11 : i64} {
  func.func @_mlp_max_kernel(%arg0: i32, %arg1: memref<16x7xbf16, #tpu.memory_space<vmem>>, %arg2: memref<7x16xbf16, #tpu.memory_space<vmem>>, %arg3: memref<1x16xf32, #tpu.memory_space<vmem>>, %arg4: memref<16x32xbf16, #tpu.memory_space<vmem>>, %arg5: memref<1x32xf32, #tpu.memory_space<vmem>>, %arg6: memref<2x32xf32, #tpu.memory_space<vmem>>) attributes {dimension_semantics = [#tpu.dimension_semantics<parallel>], iteration_bounds = array<i64: 1>, scalar_prefetch = 0 : i64, scratch_operands = 0 : i64, tpu.core_type = #tpu.core_type<tc>, window_params = [{transform_indices = @transform_0, window_bounds = array<i64: 16, 7>}, {pipeline_mode = #tpu.pipeline_mode<synchronous>, transform_indices = @transform_1, window_bounds = array<i64: 7, 16>}, {pipeline_mode = #tpu.pipeline_mode<synchronous>, transform_indices = @transform_2, window_bounds = array<i64: 1, 16>}, {pipeline_mode = #tpu.pipeline_mode<synchronous>, transform_indices = @transform_3, window_bounds = array<i64: 16, 32>}, {pipeline_mode = #tpu.pipeline_mode<synchronous>, transform_indices = @transform_4, window_bounds = array<i64: 1, 32>}, {transform_indices = @transform_5, window_bounds = array<i64: 2, 32>}]} {
    %c0 = arith.constant 0 : index
    %c0_0 = arith.constant 0 : index
    %0 = vector.load %arg1[%c0, %c0_0] : memref<16x7xbf16, #tpu.memory_space<vmem>>, vector<16x7xbf16>
    %c0_1 = arith.constant 0 : index
    %c0_2 = arith.constant 0 : index
    %1 = vector.load %arg2[%c0_1, %c0_2] : memref<7x16xbf16, #tpu.memory_space<vmem>>, vector<7x16xbf16>
    %cst = arith.constant dense<0.000000e+00> : vector<16x16xf32>
    %2 = tpu.matmul %0, %1, %cst {dimension_numbers = #tpu.dot_dimension_numbers<[1], [0], [0], [1], [0, 0, 1, 1], [], []>} : vector<16x7xbf16>, vector<7x16xbf16>, vector<16x16xf32> -> vector<16x16xf32>
    %c0_3 = arith.constant 0 : index
    %c0_4 = arith.constant 0 : index
    %3 = vector.load %arg3[%c0_3, %c0_4] : memref<1x16xf32, #tpu.memory_space<vmem>>, vector<1x16xf32>
    %4 = vector.broadcast %3 : vector<1x16xf32> to vector<16x16xf32>
    %5 = arith.addf %2, %4 : vector<16x16xf32>
    %cst_5 = arith.constant 0.000000e+00 : f32
    %6 = vector.broadcast %cst_5 : f32 to vector<16x16xf32>
    %7 = arith.maximumf %5, %6 : vector<16x16xf32>
    %8 = arith.truncf %7 : vector<16x16xf32> to vector<16x16xbf16>
    %c0_6 = arith.constant 0 : index
    %c0_7 = arith.constant 0 : index
    %9 = vector.load %arg4[%c0_6, %c0_7] : memref<16x32xbf16, #tpu.memory_space<vmem>>, vector<16x32xbf16>
    %cst_8 = arith.constant dense<0.000000e+00> : vector<16x32xf32>
    %10 = tpu.matmul %8, %9, %cst_8 {dimension_numbers = #tpu.dot_dimension_numbers<[1], [0], [0], [1], [0, 0, 1, 1], [], []>} : vector<16x16xbf16>, vector<16x32xbf16>, vector<16x32xf32> -> vector<16x32xf32>
    %c0_9 = arith.constant 0 : index
    %c0_10 = arith.constant 0 : index
    %11 = vector.load %arg5[%c0_9, %c0_10] : memref<1x32xf32, #tpu.memory_space<vmem>>, vector<1x32xf32>
    %12 = vector.broadcast %11 : vector<1x32xf32> to vector<16x32xf32>
    %13 = arith.addf %10, %12 : vector<16x32xf32>
    %cst_11 = arith.constant 0.000000e+00 : f32
    %14 = vector.broadcast %cst_11 : f32 to vector<16x32xf32>
    %15 = arith.maximumf %13, %14 : vector<16x32xf32>
    %16 = vector.shape_cast %15 : vector<16x32xf32> to vector<2x8x32xf32>
    %cst_12 = arith.constant dense<0xFF800000> : vector<2x32xf32>
    %17 = vector.multi_reduction <maximumf>, %16, %cst_12 [1] : vector<2x8x32xf32> to vector<2x32xf32>
    %c0_13 = arith.constant 0 : index
    %c0_14 = arith.constant 0 : index
    %18 = vector.load %arg6[%c0_13, %c0_14] : memref<2x32xf32, #tpu.memory_space<vmem>>, vector<2x32xf32>
    tpu.vector_store %arg6[%c0_13, %c0_14], %17 {strides = array<i32>} : memref<2x32xf32, #tpu.memory_space<vmem>>, vector<2x32xf32>,
    return
  }
  func.func @transform_0(%arg0: i32) -> (i32, i32) {
    %c0_i32 = arith.constant 0 : i32
    %c0_i32_0 = arith.constant 0 : i32
    return %arg0, %c0_i32 : i32, i32
  }
  func.func @transform_1(%arg0: i32) -> (i32, i32) {
    %c0_i32 = arith.constant 0 : i32
    %c0_i32_0 = arith.constant 0 : i32
    %c0_i32_1 = arith.constant 0 : i32
    return %c0_i32, %c0_i32_0 : i32, i32
  }
  func.func @transform_2(%arg0: i32) -> (i32, i32) {
    %c0_i32 = arith.constant 0 : i32
    %c0_i32_0 = arith.constant 0 : i32
    %c0_i32_1 = arith.constant 0 : i32
    return %c0_i32, %c0_i32_0 : i32, i32
  }
  func.func @transform_3(%arg0: i32) -> (i32, i32) {
    %c0_i32 = arith.constant 0 : i32
    %c0_i32_0 = arith.constant 0 : i32
    %c0_i32_1 = arith.constant 0 : i32
    return %c0_i32, %c0_i32_0 : i32, i32
  }
  func.func @transform_4(%arg0: i32) -> (i32, i32) {
    %c0_i32 = arith.constant 0 : i32
    %c0_i32_0 = arith.constant 0 : i32
    %c0_i32_1 = arith.constant 0 : i32
    return %c0_i32, %c0_i32_0 : i32, i32
  }
  func.func @transform_5(%arg0: i32) -> (i32, i32) {
    %c0_i32 = arith.constant 0 : i32
    %c0_i32_0 = arith.constant 0 : i32
    return %arg0, %c0_i32 : i32, i32
  }
}

</mosaic_0001>

<bundles_post_ra>
// kernel: pointnet_set_abstraction_forward.2
= control target key start
LH: loop header
LB: loop body
LE: loop exit
PB: predicated region body
PF: predicated region fallthrough
CT: control target
= control target key end

     0   :  { %vm19_vm0 = vcmask 1042432   ;;  %v228_v0 = vmov 0.0   ;;  %vm229_vm1 = vmmov 0   ;;  %vm15_vm2 = vcmask 23552   ;;  %s263_s1 = inlined_call_operand.vmem [shape: f32[2,3,64], index: 1, kind: input, shape index: {}]   ;;  %s264_s0 = inlined_call_operand.vmem [shape: f32[2,1,3], index: 0, kind: input, shape index: {}]   ;;  %s265_s2 = inlined_call_operand.vmem [shape: f32[2,1,64], index: 2, kind: output, shape index: {}]  }
   0x1   :  { %216 = vmatprep.subr.mxu0 %v228_v0  ;;  %221 = vmatprep.subr.mxu1 %v228_v0  ;;  %v13_v1 = vld [vmem:[%s263_s1] sm:$0x7]  ;;  %v14_v2 = vld [vmem:[%s263_s1 + $0x4] sm:$0x7]  ;;  %vm171_vm3 = vcmask 16384   ;;  %vm180_vm4 = vcmask 518144  }
   0x2   :  { %v11_v3 = vld [vmem:[%s264_s0] sm:$0x1]  ;;  %217 = vmatpush3.msk.msra.mxu0 %vm19_vm0, %v13_v1  ;;  %218 = vmatprep.mubr.msk.f32.mxu0 %vm229_vm1, %v228_v0  ;;  %v12_v4 = vld [vmem:[%s264_s0 + $0x1] sm:$0x1]  ;;  %v178_v9 = vmul.f32 %v13_v1, %v13_v1  ;;  %v179_v10 = vmul.f32 %v14_v2, %v14_v2  ;;  %vm201_vm5 = vcmask 516096  }
   0x3   :  { %v169_v5 = vmul.f32 %v11_v3, %v11_v3  ;;  %222 = vmatpush3.msk.msra.mxu1 %vm19_vm0, %v14_v2  ;;  %223 = vmatprep.mubr.msk.f32.mxu1 %vm229_vm1, %v228_v0  ;;  %v170_v6 = vmul.f32 %v12_v4, %v12_v4 }
   0x4   :  { %219 = vmatmul.mubr.msk.f32.vlgmr.msra.gmra.mrb[0].mxu0 %vm15_vm2, %v11_v3  ;;  %224 = vmatmul.mubr.msk.f32.vlgmr.msra.gmra.mrb[0].mxu1 %vm15_vm2, %v12_v4  ;;  %v181_v11 = vsel %vm180_vm4, %v178_v9, 0.0  ;;  %v188_v12 = vsel %vm180_vm4, %v179_v10, 0.0 }
   0x5   :  { %v172_v7 = vsel %vm171_vm3, %v169_v5, 0.0  ;;  %v175_v8 = vsel %vm171_vm3, %v170_v6, 0.0  ;;  %v182_v13 = vrot.slane %v181_v11, 4  ;;  %v189_v14 = vrot.slane %v188_v12, 4 }
   0x6   :  { %173 = vadd.xlane.f32.xlu0 %v172_v7 }
   0x7   :  { %v183_v15 = vadd.f32 %v182_v13, %v181_v11  ;;  %v190_v16 = vadd.f32 %v189_v14, %v188_v12 }
   0x9   :  { %v184_v17 = vrot.slane %v183_v15, 2  ;;  %v191_v18 = vrot.slane %v190_v16, 2 }
   0xa   :  { %176 = vadd.xlane.f32.xlu0 %v175_v8 }
   0xb   :  { %v185_v19 = vadd.f32 %v184_v17, %v183_v15  ;;  %v192_v21 = vadd.f32 %v191_v18, %v190_v16 }
   0xd   :  { %v186_v22 = vrot.slane %v185_v19, 1  ;;  %v193_v23 = vrot.slane %v192_v21, 1 }
   0xf   :  { %v187_v27 = vadd.f32 %v186_v22, %v185_v19  ;;  %v194_v32 = vadd.f32 %v193_v23, %v192_v21 }
  0x93   :  { %v174_v20 = vpop.xlane.xlu0 %173 }
  0x97   :  { %v177_v24 = vpop.xlane.xlu0 %176 }
  0xd7   :  { %v89_v25 = vpop.f32.mrb[0].mxu0  ;;  %v165_v26 = vpop.f32.mrb[0].mxu1 }
  0xd8   :  { %v195_v28 = vmul.f32 -2.0, %v89_v25  ;;  %v196_v29 = vmul.f32 -2.0, %v165_v26  ;;  %v220_v30 = vpop.f32.mrb[1].mxu0  ;;  %v225_v31 = vpop.f32.mrb[1].mxu1 }
  0xda   :  { %v197_v33 = vadd.f32 %v195_v28, %v174_v20  ;;  %v198_v34 = vadd.f32 %v196_v29, %v177_v24 }
  0xdc   :  { %v199_v35 = vadd.f32 %v197_v33, %v187_v27  ;;  %v200_v36 = vadd.f32 %v198_v34, %v194_v32 }
  0xde   :  { %202 = vst.msk [vmem:[%s265_s2] sm:$0x1] %vm201_vm5, %v199_v35  ;;  %203 = vst.msk [vmem:[%s265_s2 + $0x1] sm:$0x1] %vm201_vm5, %v200_v36 }

// kernel: pointnet_set_abstraction_forward.3
= control target key start
LH: loop header
LB: loop body
LE: loop exit
PB: predicated region body
PF: predicated region fallthrough
CT: control target
= control target key end

     0   :  { %vm41_vm0 = vcmask 1042432   ;;  %vm42_vm1 = vcmask 1043456   ;;  %v242_v1 = vmov 0.0   ;;  %v243_v2 = vmov 65535   ;;  %s303_s0 = inlined_call_operand.vmem [shape: bf16[16,7], index: 0, kind: input, shape index: {}]   ;;  %s304_s1 = inlined_call_operand.vmem [shape: bf16[7,16], index: 1, kind: input, shape index: {}]   ;;  %s305_s2 = inlined_call_operand.vmem [shape: f32[1,16], index: 2, kind: input, shape index: {}]   ;;  %s306_s3 = inlined_call_operand.vmem [shape: bf16[16,32], index: 3, kind: input, shape index: {}]   ;;  %s307_s4 = inlined_call_operand.vmem [shape: f32[1,32], index: 4, kind: input, shape index: {}]   ;;  %s308_s5 = inlined_call_operand.hbm [shape: f32[2,32], index: 5, kind: output, shape index: {}]  }
   0x1   :  { %v24_v0 = vld [vmem:[%s304_s1] sm:$0xf]  ;;  %200 = vmatprep.subr.bf16.mxu0 %v242_v1  ;;  %v43_v3 = vsel %vm41_vm0, 4294967295, %v243_v2  ;;  %206 = vmatprep.subr.bf16.mxu1 %v242_v1  ;;  %vm244_vm2 = vmmov 0  }
   0x2   :  { %v44_v4 = vsel %vm42_vm1, %v43_v3, 0  ;;  %202 = vmatprep.mubr.msk.bf16.mxu0 %vm244_vm2, %v242_v1  ;;  %208 = vmatprep.mubr.msk.bf16.mxu1 %vm244_vm2, %v242_v1 }
   0x3   :  { %v46_v5 = vand.u32 %v44_v4, %v24_v0 }
   0x4   :  { %10 = vsyncpa [#allocation3], 0  ;;  %v216_v6 = vld [vmem:[%s303_s0] sm:$0xff]   ;;  %vm37_vm3 = vcmask 56320   ;;  %vm107_vm4 = vcmask 130048   ;;  %vm154_vm5 = vcmask 261120  }
   0x5   :  { %201 = vmatpush3.bf16.msra.mxu0 %v46_v5  ;;  %v217_v7 = vld [vmem:[%s306_s3] sm:$0xff]   ;;  %vm171_vm6 = vcmask 1041409   ;;  %vm174_vm7 = vcmask 254976  }
   0x6   :  { %207 = vmatpush3.bf16.msra.mxu1 %v217_v7  ;;  %v190_v8 = vld [vmem:[%s305_s2] ss:$0 sm:$0xff]  ;;  %s245_s2 = smov [#allocation2]  }
   0x7   :  { %v193_v18 = vld [vmem:[%s307_s4] ss:$0 sm:$0xff]  ;;  %s182_s3 = sshll.u32 %s245_s2, 4  ;;  %s183_s3 = int_to_ptr.vmem [resolvable:$true] %s182_s3 }
   0x8   :  { %203 = vmatmul.mubr.msk.bf16.vlgmr.msra.gmra.mrb[0].mxu0 %vm37_vm3, %v216_v6  ;;  %s218_s4 = scalar_lea.vmem %s183_s3, 32  ;;  %p223_p1 = scmp.lt.s32.totalorder %s183_s3, %s183_s3 }
   0x9   :  { %p219_p0 = scmp.ne.s32.totalorder %s183_s3, %s218_s4  ;;  %p224_p2 = scmp.lt.s32.totalorder %s218_s4, %s218_s4 }
   0xb   :  { %p225_p3 = por %p224_p2, %p223_p1 }
   0xd   :  { %p226_p4 = pnand %p225_p3, %p219_p0 }
  0xdb   :  { %v82_v9 = vpop.f32.mrb[0].mxu0 }
  0xdc   :  { %v83_v10 = vadd.f32 %v190_v8, %v82_v9  ;;  %v204_v11 = vpop.f32.mrb[1].mxu0 }
  0xdd   :  { %v85_v12 = vpop.f32.mrb[2].mxu0 }
  0xde   :  { %v86_v13 = vadd.f32 %v190_v8, %v85_v12  ;;  %v205_v14 = vpop.f32.mrb[3].mxu0  ;;  %v89_v15 = vmax.f32 %v83_v10, 0.0 }
  0xe0   :  { %v90_v16 = vmax.f32 %v86_v13, 0.0 }
  0xe2   :  { %v91_v17 = vpack.c.bf16 %v90_v16, %v89_v15 }
  0xe4   :  { %209 = vmatmul.mubr.msk.bf16.vlgmr.msra.gmra.mrb[0].mxu1 %vm107_vm4, %v91_v17 }
 0x1b7   :  { %v145_v19 = vpop.f32.mrb[0].mxu1 }
 0x1b8   :  { %v146_v20 = vadd.f32 %v193_v18, %v145_v19  ;;  %v210_v21 = vpop.f32.mrb[1].mxu1 }
 0x1b9   :  { %v148_v22 = vpop.f32.mrb[2].mxu1 }
 0x1ba   :  { %v152_v23 = vmax.f32 %v146_v20, 0.0  ;;  %v149_v24 = vadd.f32 %v193_v18, %v148_v22  ;;  %v211_v25 = vpop.f32.mrb[3].mxu1 }
 0x1bc   :  { %v155_v26 = vsel %vm154_vm5, %v152_v23, -inf  ;;  %v153_v27 = vmax.f32 %v149_v24, 0.0 }
 0x1bd   :  { %v156_v28 = vrot.slane %v155_v26, 4 }
 0x1be   :  { %v162_v29 = vsel %vm154_vm5, %v153_v27, -inf }
 0x1bf   :  { %v157_v30 = vmax.f32 %v155_v26, %v156_v28  ;;  %v163_v31 = vrot.slane %v162_v29, 4 }
 0x1c1   :  { %v158_v32 = vrot.slane %v157_v30, 2  ;;  %v164_v33 = vmax.f32 %v162_v29, %v163_v31 }
 0x1c3   :  { %v159_v34 = vmax.f32 %v157_v30, %v158_v32  ;;  %v165_v35 = vrot.slane %v164_v33, 2 }
 0x1c5   :  { %v160_v36 = vrot.slane %v159_v34, 1  ;;  %v166_v37 = vmax.f32 %v164_v33, %v165_v35 }
 0x1c7   :  { %v167_v38 = vrot.slane %v166_v37, 1  ;;  %v161_v39 = vmax.f32 %v159_v34, %v160_v36 }
 0x1c9   :  { %v168_v40 = vmax.f32 %v166_v37, %v167_v38 }
 0x1cb   :  { %v172_v41 = vsel %vm171_vm6, %v168_v40, %v161_v39 }
 0x1cc   :  { %175 = vst.msk [vmem:[#allocation2] sm:$0x3] %vm174_vm7, %v172_v41 }
 0x1cd   :  { %229 = shalt.err (!%p226_p4)
}
 0x1ce   :  { %s230_s28 = scalar_lea.hbm %s308_s5, 32 }
 0x1cf   :  { %p231_p5 = scmp.ne.s32.totalorder %s308_s5, %s230_s28  ;;  %p234_p6 = scmp.lt.u32.totalorder %s230_s28, %s308_s5 }
 0x1d1   :  { %p236_p7 = pnand %p234_p6, %p231_p5 }
 0x1d3   :  { %239 = shalt.err (!%p236_p7)
}
 0x1d4   :  { %185 = dma.vmem_to_hbm [thread:$0]  %s183_s3, 32, %s308_s5, [#allocation3]  }
 0x1d5   :  { %240 = dma.done.wait [#allocation3], 32  }
 0x1d6   :  { %241 = vsyncadd [#allocation3], 4294967264 }
 0x1d7   :  { %189 = vsyncpa [#allocation3], 1 }

</bundles_post_ra>
